<compile_context>
chip_gen: v7x
topology: tpu7x:2x2x1
jax: 0.10.0
libtpu: 0.0.40
codegen_flags: <defaults>
</compile_context>

<pallas_src>
import math
import functools

import jax
import jax.numpy as jnp
from jax import lax
from jax.experimental import pallas as pl
from jax.experimental.pallas import tpu as pltpu


_VMEM_LIMIT = 32 * 1024 * 1024          # explicit scoped-VMEM budget (all gens)


# ------------------------------ small helpers ------------------------------ #

def _round_up(x, m):
    return ((x + m - 1) // m) * m


def _pad_axis(x, axis, target):
    pad = target - x.shape[axis]
    if pad == 0:
        return x
    widths = [(0, 0)] * x.ndim
    widths[axis] = (0, pad)
    return jnp.pad(x, widths)


def _apply_p(diff, p_norm):
    if p_norm == 1:
        return jnp.abs(diff)
    if p_norm == 2:
        return diff * diff
    # generic p: EUP pow -- correct but slow; not recommended for all-entity modes.
    return jnp.abs(diff) ** p_norm


def _finish_p(dist, p_norm):
    if p_norm == 1:
        return dist
    if p_norm == 2:
        return jnp.sqrt(dist)
    return dist ** (1.0 / p_norm)


# ------------------------------ Pallas kernels ------------------------------ #

def _hrt_kernel(h_ref, r_ref, t_ref, out_ref, *, p_norm):
    # h_ref / r_ref / t_ref: (TB, D)   out_ref: (TB, 1)
    diff = h_ref[...] + r_ref[...] - t_ref[...]
    dist = jnp.sum(_apply_p(diff, p_norm), axis=-1, keepdims=True)
    out_ref[...] = -_finish_p(dist, p_norm)


def _cand_kernel(h_ref, r_ref, c_ref, out_ref, *, p_norm):
    # h_ref / r_ref: (TB, D)   c_ref: (TB, TN, D)   out_ref: (TB, TN)
    hr = h_ref[...] + r_ref[...]
    diff = hr[:, None, :] - c_ref[...]
    dist = jnp.sum(_apply_p(diff, p_norm), axis=-1)
    out_ref[...] = -_finish_p(dist, p_norm)


def _all_elem_kernel(qT_ref, rT_ref, entT_ref, out_ref, acc_ref, *, p_norm, d_chunk):
    # qT_ref / rT_ref: (D, TB)   entT_ref: (D, TE)   out_ref / acc_ref: (TB, TE)
    acc_ref[...] = jnp.zeros_like(acc_ref)
    n_chunks = qT_ref.shape[0] // d_chunk

    def body(c, carry):
        off = pl.multiple_of(c * d_chunk, d_chunk)
        hr_c = qT_ref[pl.ds(off, d_chunk), :] + rT_ref[pl.ds(off, d_chunk), :]
        e_c = entT_ref[pl.ds(off, d_chunk), :]
        diff = hr_c[:, :, None] - e_c[:, None, :]          # (dc, TB, TE) live slab
        acc_ref[...] += jnp.sum(_apply_p(diff, p_norm), axis=0)
        return carry

    lax.fori_loop(0, n_chunks, body, 0)
    out_ref[...] = -_finish_p(acc_ref[...], p_norm)


def _all_gemm_kernel(q_ref, r_ref, entT_ref, e2_ref, out_ref):
    # p_norm == 2 path: dist^2 = ||q+r||^2 + ||e||^2 - 2 (q+r) @ e^T  (MXU).
    hr = q_ref[...] + r_ref[...]                           # (TB, D)
    q2 = jnp.sum(hr * hr, axis=-1, keepdims=True)          # (TB, 1)
    cross = jnp.dot(hr, entT_ref[...],
                    preferred_element_type=jnp.float32,
                    precision=jax.lax.Precision.HIGHEST)   # (TB, TE)
    dist2 = jnp.maximum(q2 + e2_ref[...] - 2.0 * cross, 0.0)
    out_ref[...] = -jnp.sqrt(dist2)


# ------------------------------ score wrappers ------------------------------ #

def transe_score_pointwise(head, relation, tail, p_norm=1):
    """head, relation, tail: (B, D) float32 -> scores (B,)."""
    B, D = head.shape
    # HBM-bound mode: big batch tiles (3 inputs x 2 pipeline buffers <= ~12 MiB).
    cap = max(8, min(2048, ((12 << 20) // (6 * D * 4)) // 8 * 8))
    TB = min(cap, _round_up(B, 8))
    Bp = _round_up(B, TB)
    h_p = _pad_axis(head, 0, Bp)
    r_p = _pad_axis(relation, 0, Bp)
    t_p = _pad_axis(tail, 0, Bp)
    out = pl.pallas_call(
        functools.partial(_hrt_kernel, p_norm=p_norm),
        out_shape=jax.ShapeDtypeStruct((Bp, 1), jnp.float32),
        grid=(Bp // TB,),
        in_specs=[pl.BlockSpec((TB, D), lambda i: (i, 0)),
                  pl.BlockSpec((TB, D), lambda i: (i, 0)),
                  pl.BlockSpec((TB, D), lambda i: (i, 0))],
        out_specs=pl.BlockSpec((TB, 1), lambda i: (i, 0)),
        compiler_params=pltpu.CompilerParams(
            dimension_semantics=("parallel",),
            vmem_limit_bytes=_VMEM_LIMIT),
    )(h_p, r_p, t_p)
    return out[:B, 0]


def transe_score_candidates(head, relation, cand, p_norm=1):
    """head, relation: (B, D); cand: (B, N, D) -> scores (B, N)."""
    B, D = head.shape
    N = cand.shape[1]
    blk_budget = 4 << 20                                   # candidate block budget
    if 8 * N * D * 4 <= blk_budget:
        TN, Np = N, N                                      # whole-N block fits
    else:
        TN = 512                                           # lane-dense output tiles
        while TN > 128 and 8 * TN * D * 4 > blk_budget:
            TN -= 128
        Np = _round_up(N, TN)
    TB = blk_budget // max(1, TN * D * 4)
    TB = max(8, min(256, (TB // 8) * 8))
    TB = min(TB, _round_up(B, 8))
    Bp = _round_up(B, TB)
    head_p = _pad_axis(head, 0, Bp)
    rel_p = _pad_axis(relation, 0, Bp)
    cand_p = _pad_axis(_pad_axis(cand, 1, Np), 0, Bp)      # (Bp, Np, D)
    out = pl.pallas_call(
        functools.partial(_cand_kernel, p_norm=p_norm),
        out_shape=jax.ShapeDtypeStruct((Bp, Np), jnp.float32),
        # batch outer, N inner: h/r blocks stay resident across candidate tiles.
        grid=(Bp // TB, Np // TN),
        in_specs=[pl.BlockSpec((TB, D), lambda b, n: (b, 0)),
                  pl.BlockSpec((TB, D), lambda b, n: (b, 0)),
                  pl.BlockSpec((TB, TN, D), lambda b, n: (b, n, 0))],
        out_specs=pl.BlockSpec((TB, TN), lambda b, n: (b, n)),
        compiler_params=pltpu.CompilerParams(
            dimension_semantics=("parallel", "parallel"),
            vmem_limit_bytes=_VMEM_LIMIT),
    )(head_p, rel_p, cand_p)
    return out[:B, :N]


def transe_score_all(query, relation, ent_table, p_norm=1):
    """Scores -|| query + relation - e ||_p for every table row e.

    query, relation: (B, D); ent_table: (E, D)  ->  (B, E)
    The table is streamed once (entity tiles on the outer grid axis).
    """
    B, D = query.shape
    E = ent_table.shape[0]
    TB = min(256, _round_up(B, 8))        # large M-dim for real batches (MXU-friendly)
    Bp = _round_up(B, TB)
    TE = min(512, _round_up(E, 128))      # 256-multiple when tiled (v6e/v7x MXU N-dim)
    Ep = _round_up(E, TE)
    q_p = _pad_axis(query, 0, Bp)
    r_p = _pad_axis(relation, 0, Bp)
    ent_p = _pad_axis(ent_table, 0, Ep)
    entT = ent_p.T                                         # (D, Ep)
    grid = (Ep // TE, Bp // TB)           # entity tile outer -> DMA'd once, reused
    cparams = pltpu.CompilerParams(
        dimension_semantics=("parallel", "parallel"),
        vmem_limit_bytes=_VMEM_LIMIT)

    if p_norm == 2:
        # GEMM reformulation: cross term on the MXU, clamp before sqrt.
        e2 = jnp.sum(ent_p * ent_p, axis=-1)[None, :]      # (1, Ep)
        out = pl.pallas_call(
            _all_gemm_kernel,
            out_shape=jax.ShapeDtypeStruct((Bp, Ep), jnp.float32),
            grid=grid,
            in_specs=[pl.BlockSpec((TB, D), lambda e, b: (b, 0)),
                      pl.BlockSpec((TB, D), lambda e, b: (b, 0)),
                      pl.BlockSpec((D, TE), lambda e, b: (0, e)),
                      pl.BlockSpec((1, TE), lambda e, b: (0, e))],
            out_specs=pl.BlockSpec((TB, TE), lambda e, b: (b, e)),
            compiler_params=cparams,
        )(q_p, r_p, entT, e2)
        return out[:B, :E]

    # p = 1 / generic p: elementwise path with an in-kernel D-chunked accumulator
    # so the live broadcast slab is only (d_chunk, TB, TE) while the output tile
    # stays large and lane-dense.  Queries are transposed once in the wrapper
    # (tiny relative to the table / output streams).
    d_chunk = 8
    qT = q_p.T                                             # (D, Bp)
    rT = r_p.T
    out = pl.pallas_call(
        functools.partial(_all_elem_kernel, p_norm=p_norm, d_chunk=d_chunk),
        out_shape=jax.ShapeDtypeStruct((Bp, Ep), jnp.float32),
        grid=grid,
        in_specs=[pl.BlockSpec((D, TB), lambda e, b: (0, b)),
                  pl.BlockSpec((D, TB), lambda e, b: (0, b)),
                  pl.BlockSpec((D, TE), lambda e, b: (0, e))],
        out_specs=pl.BlockSpec((TB, TE), lambda e, b: (b, e)),
        scratch_shapes=[pltpu.VMEM((TB, TE), jnp.float32)],
        compiler_params=cparams,
    )(qT, rT, entT)
    return out[:B, :E]


# ------------------------- parameter initialization ------------------------- #

def init_transe(key, n_entity, n_relation, dim, gamma=None):
    if gamma is not None:
        rng = (gamma + 2.0) / dim
    else:
        rng = 6.0 / math.sqrt(dim)
    k1, k2 = jax.random.split(key)
    ent = jax.random.uniform(k1, (n_entity, dim), jnp.float32, -rng, rng)
    rel = jax.random.uniform(k2, (n_relation, dim), jnp.float32, -rng, rng)
    # Store tables lane-padded (D -> multiple of 128); zero columns contribute
    # nothing to any p-norm so scores are unchanged.
    dim_p = _round_up(dim, 128)
    ent = _pad_axis(ent, 1, dim_p)
    rel = _pad_axis(rel, 1, dim_p)
    return {"entity_embedding": ent, "relation_embedding": rel, "dim": dim}


# ------------------------------- forward glue -------------------------------- #

def transe_forward(params, h, r, t, mode="hrt", p_norm=1):
    ent = params["entity_embedding"]
    rel_tab = params["relation_embedding"]
    n_entity, D = ent.shape

    relation = jnp.take(rel_tab, r.reshape(-1), axis=0)               # (B, D)

    if mode == "hrt":
        head = jnp.take(ent, h.reshape(-1), axis=0)                   # (B, D)
        tail = jnp.take(ent, t.reshape(-1), axis=0)                   # (B, D)
        return transe_score_pointwise(head, relation, tail, p_norm)   # (B,)

    if mode == "hr_t":
        B, N = t.shape
        head = jnp.take(ent, h.reshape(-1), axis=0)                   # (B, D)
        cand = jnp.take(ent, t.reshape(-1), axis=0).reshape(B, N, D)
        return transe_score_candidates(head, relation, cand, p_norm)  # (B, N)

    if mode == "h_rt":
        # ||c + r - t||_p == ||t + (-r) - c||_p
        B, N = h.shape
        tail = jnp.take(ent, t.reshape(-1), axis=0)                   # (B, D)
        cand = jnp.take(ent, h.reshape(-1), axis=0).reshape(B, N, D)
        return transe_score_candidates(tail, -relation, cand, p_norm)

    if mode == "hr_all":
        head = jnp.take(ent, h.reshape(-1), axis=0)                   # (B, D)
        return transe_score_all(head, relation, ent, p_norm)          # (B, E)

    if mode == "all_rt":
        # ||e + r - t||_p == ||(t - r) - e||_p
        tail = jnp.take(ent, t.reshape(-1), axis=0)                   # (B, D)
        return transe_score_all(tail, -relation, ent, p_norm)         # (B, E)

    raise ValueError(f"unknown mode {mode}")


# ---------------------------- pure-JAX reference ----------------------------- #

def transe_reference(params, h, r, t, mode="hrt", p_norm=1):
    ent = params["entity_embedding"]
    rel_tab = params["relation_embedding"]

    def norm(x):
        if p_norm == 1:
            return jnp.sum(jnp.abs(x), axis=-1)
        if p_norm == 2:
            return jnp.sqrt(jnp.sum(x * x, axis=-1))
        return jnp.sum(jnp.abs(x) ** p_norm, axis=-1) ** (1.0 / p_norm)

    relation = jnp.take(rel_tab, r.reshape(-1), axis=0)[:, None, :]   # (B,1,D)
    if mode == "hrt":
        head = jnp.take(ent, h.reshape(-1), axis=0)
        tail = jnp.take(ent, t.reshape(-1), axis=0)
        return -norm(head + relation[:, 0, :] - tail)
    if mode == "hr_t":
        B, N = t.shape
        head = jnp.take(ent, h.reshape(-1), axis=0)[:, None, :]
        tail = jnp.take(ent, t.reshape(-1), axis=0).reshape(B, N, -1)
        return -norm(head + relation - tail)
    if mode == "h_rt":
        B, N = h.shape
        head = jnp.take(ent, h.reshape(-1), axis=0).reshape(B, N, -1)
        tail = jnp.take(ent, t.reshape(-1), axis=0)[:, None, :]
        return -norm(head + (relation - tail))
    if mode == "hr_all":
        head = jnp.take(ent, h.reshape(-1), axis=0)[:, None, :]
        return -norm(head + relation - ent[None, :, :])
    if mode == "all_rt":
        tail = jnp.take(ent, t.reshape(-1), axis=0)[:, None, :]
        return -norm(ent[None, :, :] + (relation - tail))
    raise ValueError(mode)


# ----------------------------------- main ------------------------------------ #

if __name__ == "__main__":
    key = jax.random.PRNGKey(0)
    n_entity, n_relation, dim = 64, 16, 32
    batch, neg = 4, 8

    pkey, hkey, rkey, tkey, n1key, n2key = jax.random.split(key, 6)
    params = init_transe(pkey, n_entity, n_relation, dim, gamma=None)

    h = jax.random.randint(hkey, (batch,), 0, n_entity, dtype=jnp.int32)
    r = jax.random.randint(rkey, (batch,), 0, n_relation, dtype=jnp.int32)
    t = jax.random.randint(tkey, (batch,), 0, n_entity, dtype=jnp.int32)
    t_neg = jax.random.randint(n1key, (batch, neg), 0, n_entity, dtype=jnp.int32)
    h_neg = jax.random.randint(n2key, (batch, neg), 0, n_entity, dtype=jnp.int32)

    def check(mode, hh, rr, tt, p_norm, shape, atol=1e-3, rtol=1e-4):
        got = jax.block_until_ready(
            transe_forward(params, hh, rr, tt, mode=mode, p_norm=p_norm))
        ref = transe_reference(params, hh, rr, tt, mode=mode, p_norm=p_norm)
        assert got.shape == shape, (mode, got.shape, shape)
        assert jnp.allclose(got, ref, atol=atol, rtol=rtol), (
            mode, p_norm, float(jnp.max(jnp.abs(got - ref))))

    # p_norm = 1 (default)
    check("hrt",    h, r, t,     1, (batch,))
    check("hr_t",   h, r, t_neg, 1, (batch, neg))
    check("h_rt",   h_neg, r, t, 1, (batch, neg))
    check("hr_all", h, r, t,     1, (batch, n_entity))
    check("all_rt", h, r, t,     1, (batch, n_entity))

    # p_norm = 2 (sqrt paths; hr_all/all_rt exercise the MXU GEMM reformulation)
    check("hrt",    h, r, t,     2, (batch,))
    check("hr_t",   h, r, t_neg, 2, (batch, neg))
    check("hr_all", h, r, t,     2, (batch, n_entity), atol=1e-2, rtol=1e-3)
    check("all_rt", h, r, t,     2, (batch, n_entity), atol=1e-2, rtol=1e-3)

    print("KERNEL_OK")
</pallas_src>

<mosaic_0001>
module attributes {stable_mosaic.version = 11 : i64} {
  func.func @_hrt_kernel(%arg0: i32, %arg1: memref<8x128xf32, #tpu.memory_space<vmem>>, %arg2: memref<8x128xf32, #tpu.memory_space<vmem>>, %arg3: memref<8x128xf32, #tpu.memory_space<vmem>>, %arg4: memref<8x1xf32, #tpu.memory_space<vmem>>) attributes {dimension_semantics = [#tpu.dimension_semantics<parallel>], iteration_bounds = array<i64: 1>, scalar_prefetch = 0 : i64, scratch_operands = 0 : i64, tpu.core_type = #tpu.core_type<tc>, window_params = [{transform_indices = @transform_0, window_bounds = array<i64: 8, 128>}, {transform_indices = @transform_1, window_bounds = array<i64: 8, 128>}, {transform_indices = @transform_2, window_bounds = array<i64: 8, 128>}, {transform_indices = @transform_3, window_bounds = array<i64: 8, 1>}]} {
    %c0 = arith.constant 0 : index
    %c0_0 = arith.constant 0 : index
    %0 = vector.load %arg1[%c0, %c0_0] : memref<8x128xf32, #tpu.memory_space<vmem>>, vector<8x128xf32>
    %c0_1 = arith.constant 0 : index
    %c0_2 = arith.constant 0 : index
    %1 = vector.load %arg2[%c0_1, %c0_2] : memref<8x128xf32, #tpu.memory_space<vmem>>, vector<8x128xf32>
    %2 = arith.addf %0, %1 : vector<8x128xf32>
    %c0_3 = arith.constant 0 : index
    %c0_4 = arith.constant 0 : index
    %3 = vector.load %arg3[%c0_3, %c0_4] : memref<8x128xf32, #tpu.memory_space<vmem>>, vector<8x128xf32>
    %4 = arith.subf %2, %3 : vector<8x128xf32>
    %5 = math.absf %4 : vector<8x128xf32>
    %cst = arith.constant dense<0.000000e+00> : vector<8xf32>
    %6 = vector.multi_reduction <add>, %5, %cst [1] : vector<8x128xf32> to vector<8xf32>
    %7 = vector.shape_cast %6 : vector<8xf32> to vector<8x1xf32>
    %cst_5 = arith.constant 0.000000e+00 : f32
    %8 = vector.broadcast %cst_5 : f32 to vector<8x1xf32>
    %9 = arith.subf %8, %7 : vector<8x1xf32>
    %c0_6 = arith.constant 0 : index
    %c0_7 = arith.constant 0 : index
    %10 = vector.load %arg4[%c0_6, %c0_7] : memref<8x1xf32, #tpu.memory_space<vmem>>, vector<8x1xf32>
    tpu.vector_store %arg4[%c0_6, %c0_7], %9 {strides = array<i32>} : memref<8x1xf32, #tpu.memory_space<vmem>>, vector<8x1xf32>,
    return
  }
  func.func @transform_0(%arg0: i32) -> (i32, i32) {
    %c0_i32 = arith.constant 0 : i32
    %c0_i32_0 = arith.constant 0 : i32
    return %arg0, %c0_i32 : i32, i32
  }
  func.func @transform_1(%arg0: i32) -> (i32, i32) {
    %c0_i32 = arith.constant 0 : i32
    %c0_i32_0 = arith.constant 0 : i32
    return %arg0, %c0_i32 : i32, i32
  }
  func.func @transform_2(%arg0: i32) -> (i32, i32) {
    %c0_i32 = arith.constant 0 : i32
    %c0_i32_0 = arith.constant 0 : i32
    return %arg0, %c0_i32 : i32, i32
  }
  func.func @transform_3(%arg0: i32) -> (i32, i32) {
    %c0_i32 = arith.constant 0 : i32
    %c0_i32_0 = arith.constant 0 : i32
    return %arg0, %c0_i32 : i32, i32
  }
}

</mosaic_0001>

<bundles_post_ra>
// kernel: tpu_custom_call.1
= control target key start
LH: loop header
LB: loop body
LE: loop exit
PB: predicated region body
PF: predicated region fallthrough
CT: control target
= control target key end

     0   :  { %8 = vsyncpa [#allocation3], 0  ;;  %s201_s0 = inlined_call_operand.hbm [shape: f32[8,128], index: 0, kind: input, shape index: {}]   ;;  %s202_s1 = inlined_call_operand.hbm [shape: f32[8,128], index: 1, kind: input, shape index: {}]   ;;  %s203_s2 = inlined_call_operand.hbm [shape: f32[8,128], index: 2, kind: input, shape index: {}]   ;;  %s204_s3 = inlined_call_operand.vmem [shape: f32[8,1], index: 3, kind: output, shape index: {}]  }
   0x1   :  { %9 = vsyncpa [#allocation5], 0  ;;  %s139_s12 = smov [#allocation4]   ;;  %s140_s14 = smov [#allocation2]  }
   0x2   :  { %s26_s13 = sshll.u32 %s139_s12, 4  ;;  %s16_s15 = sshll.u32 %s140_s14, 4  ;;  %s27_s13 = int_to_ptr.vmem [resolvable:$true] %s26_s13  ;;  %s17_s15 = int_to_ptr.vmem [resolvable:$true] %s16_s15 }
   0x3   :  { %s69_s18 = scalar_lea.hbm %s202_s1, 128 }
   0x4   :  { %p70_p0 = scmp.ne.s32.totalorder %s202_s1, %s69_s18  ;;  %p73_p1 = scmp.lt.u32.totalorder %s69_s18, %s202_s1 }
   0x6   :  { %p75_p2 = pnand %p73_p1, %p70_p0 }
   0x8   :  { %78 = shalt.err (!%p75_p2)
}
   0x9   :  { %s79_s23 = scalar_lea.vmem %s27_s13, 128  ;;  %p84_p4 = scmp.lt.s32.totalorder %s27_s13, %s27_s13 }
   0xa   :  { %p80_p3 = scmp.ne.s32.totalorder %s27_s13, %s79_s23  ;;  %p85_p5 = scmp.lt.s32.totalorder %s79_s23, %s79_s23 }
   0xc   :  { %p86_p6 = por %p85_p5, %p84_p4 }
   0xe   :  { %p87_p7 = pnand %p86_p6, %p80_p3 }
  0x10   :  { %90 = shalt.err (!%p87_p7)
}
  0x11   :  { %29 = dma.hbm_to_vmem [thread:$0]  %s202_s1, 128, %s27_s13, [#allocation5]  }
  0x12   :  { %s91_s28 = scalar_lea.hbm %s201_s0, 128 }
  0x13   :  { %p92_p8 = scmp.ne.s32.totalorder %s201_s0, %s91_s28  ;;  %p95_p9 = scmp.lt.u32.totalorder %s91_s28, %s201_s0 }
  0x15   :  { %p97_p10 = pnand %p95_p9, %p92_p8 }
  0x17   :  { %100 = shalt.err (!%p97_p10)
}
  0x18   :  { %s101_s6 = scalar_lea.vmem %s17_s15, 128  ;;  %p106_p12 = scmp.lt.s32.totalorder %s17_s15, %s17_s15 }
  0x19   :  { %p102_p11 = scmp.ne.s32.totalorder %s17_s15, %s101_s6  ;;  %p107_p13 = scmp.lt.s32.totalorder %s101_s6, %s101_s6 }
  0x1b   :  { %p108_p0 = por %p107_p13, %p106_p12 }
  0x1d   :  { %p109_p1 = pnand %p108_p0, %p102_p11 }
  0x1f   :  { %112 = shalt.err (!%p109_p1)
}
  0x20   :  { %19 = dma.hbm_to_vmem [thread:$0]  %s201_s0, 128, %s17_s15, [#allocation3]  }
  0x21   :  { %s141_s8 = smov [#allocation6]   ;;  %s113_s12 = scalar_lea.hbm %s203_s2, 128 }
  0x22   :  { %s36_s9 = sshll.u32 %s141_s8, 4  ;;  %p114_p2 = scmp.ne.s32.totalorder %s203_s2, %s113_s12  ;;  %s37_s9 = int_to_ptr.vmem [resolvable:$true] %s36_s9 }
  0x23   :  { %p117_p3 = scmp.lt.u32.totalorder %s113_s12, %s203_s2 }
  0x25   :  { %p119_p4 = pnand %p117_p3, %p114_p2 }
  0x27   :  { %122 = shalt.err (!%p119_p4)
}
  0x28   :  { %s123_s18 = scalar_lea.vmem %s37_s9, 128  ;;  %p128_p6 = scmp.lt.s32.totalorder %s37_s9, %s37_s9 }
  0x29   :  { %p124_p5 = scmp.ne.s32.totalorder %s37_s9, %s123_s18  ;;  %p129_p7 = scmp.lt.s32.totalorder %s123_s18, %s123_s18 }
  0x2b   :  { %p130_p8 = por %p129_p7, %p128_p6 }
  0x2d   :  { %p131_p9 = pnand %p130_p8, %p124_p5 }
  0x2f   :  { %134 = shalt.err (!%p131_p9)
}
  0x30   :  { %39 = dma.hbm_to_vmem [thread:$0]  %s203_s2, 128, %s37_s9, [#allocation5]  }
  0x31   :  { %135 = dma.done.wait [#allocation3], 128  }
  0x32   :  { %136 = vsyncadd [#allocation3], 4294967168 }
  0x33   :  { %137 = dma.done.wait [#allocation5], 256  }
  0x34   :  { %138 = vsyncadd [#allocation5], 4294967040  ;;  %v49_v0 = vld [vmem:[#allocation2] sm:$0xff]  ;;  %v50_v1 = vld [vmem:[#allocation4] sm:$0xff]  ;;  %vm58_vm0 = vcmask 7168  }
  0x35   :  { %v52_v2 = vld [vmem:[#allocation6] sm:$0xff]  ;;  %v51_v3 = vadd.f32 %v50_v1, %v49_v0 }
  0x37   :  { %v53_v4 = vsub.f32 %v51_v3, %v52_v2 }
  0x39   :  { %v54_v5 = vand.u32 2147483647, %v53_v4 }
  0x3b   :  { %55 = vadd.xlane.f32.xlu0 %v54_v5 }
  0xc8   :  { %v56_v6 = vpop.xlane.xlu0 %55 }
  0xc9   :  { %v57_v7 = vsub.f32 0.0, %v56_v6 }
  0xcb   :  { %59 = vst.msk [vmem:[%s204_s3] sm:$0xff] %vm58_vm0, %v57_v7 }
  0xcc   :  { %64 = vsyncpa [#allocation3], 1 }
  0xcd   :  { %65 = vsyncpa [#allocation5], 1 }

</bundles_post_ra>
